<compile_context>
chip_gen: v7x
topology: tpu7x:2x2x1
jax: 0.10.0
libtpu: 0.0.40
codegen_flags: <defaults>
</compile_context>

<pallas_src>
import functools
import math

import jax
import jax.numpy as jnp
from jax import lax
from jax.experimental import pallas as pl
from jax.experimental.pallas import tpu as pltpu


def _mha_kernel(x_ref, wqkv_ref, bqkv_ref, wp_ref, bp_ref, out_ref, *, num_heads, head_size):
    """One batch element: full causal multi-head attention.

    x_ref:    (T, C)       float32    input tokens for this batch element
    wqkv_ref: (C, 3*H*hs)  bfloat16   fused [Q_all | K_all | V_all] projection weights
    bqkv_ref: (1, 3*H*hs)  float32    fused projection bias
    wp_ref:   (H*hs, Cp)   bfloat16   output projection, lane-padded to Cp
    bp_ref:   (1, Cp)      float32    output projection bias, lane-padded
    out_ref:  (T, Cp)      float32    lane-dense output slab
    """
    H, hs = num_heads, head_size
    Hhs = H * hs
    x = x_ref[...]                                        # (T, C) f32
    T = x.shape[0]
    scale = 1.0 / math.sqrt(hs)

    # --- Fused QKV projection: one lane-dense MXU matmul + one bias add. ---
    qkv = jnp.dot(x.astype(jnp.bfloat16), wqkv_ref[...],
                  preferred_element_type=jnp.float32) + bqkv_ref[...]        # (T, 3*Hhs)

    # Split on H*hs boundaries; bring heads to the leading (batch) axis; scale q (small tensor).
    q = jnp.transpose(qkv[:, 0 * Hhs:1 * Hhs].reshape(T, H, hs), (1, 0, 2)) * scale
    k = jnp.transpose(qkv[:, 1 * Hhs:2 * Hhs].reshape(T, H, hs), (1, 0, 2))
    v = jnp.transpose(qkv[:, 2 * Hhs:3 * Hhs].reshape(T, H, hs), (1, 0, 2))  # (H, T, hs)

    # --- Scores, batched over heads (bf16 operands, f32 accumulation). ---
    s = jnp.einsum('hqd,hkd->hqk',
                   q.astype(jnp.bfloat16), k.astype(jnp.bfloat16),
                   preferred_element_type=jnp.float32)                       # (H, T, T)

    # Causal mask generated in-kernel (VPU filler, hides under the MXU-bound score matmul).
    row = lax.broadcasted_iota(jnp.int32, (T, T), 0)
    col = lax.broadcasted_iota(jnp.int32, (T, T), 1)
    s = jnp.where((col <= row)[None], s, -1e30)           # -1e30 (not -inf): NaN-safe in f32

    # --- Numerically stable softmax with deferred normalization (f32 elementwise). ---
    m = jnp.max(s, axis=-1, keepdims=True)                                   # (H, T, 1)
    p = jnp.exp(s - m)                                                       # un-normalized
    l = jnp.sum(p, axis=-1, keepdims=True)                                   # (H, T, 1)

    o = jnp.einsum('hqk,hkd->hqd',
                   p.astype(jnp.bfloat16), v.astype(jnp.bfloat16),
                   preferred_element_type=jnp.float32)                       # (H, T, hs)
    o = o * pl.reciprocal(l, approx=True)                 # normalize the small tensor (EUP slot)

    # --- Head-concat + output projection fused into one lane-dense matmul. ---
    o2 = jnp.transpose(o, (1, 0, 2)).reshape(T, Hhs)                         # (T, H*hs)
    out = jnp.dot(o2.astype(jnp.bfloat16), wp_ref[...],
                  preferred_element_type=jnp.float32) + bp_ref[...]          # (T, Cp)
    out_ref[...] = out.astype(out_ref.dtype)              # unmasked, lane-dense store


def multi_head_attention(x, wq, bq, wk, bk, wv, bv, wp, bp, *, num_heads, head_size):
    """x: (B, T, C); wq/wk/wv: (H, C, hs); bq/bk/bv: (H, 1, hs); wp: (H*hs, C); bp: (1, C)."""
    B, T, C = x.shape
    H, hs = num_heads, head_size
    Hhs = H * hs
    assert wq.shape == (H, C, hs)

    LANES = 128
    Cp = ((C + LANES - 1) // LANES) * LANES               # lane-dense output width

    # Fuse per-head Q/K/V weights into one (C, 3*H*hs) slab laid out [Q_all | K_all | V_all],
    # where each *_all block is (C, H*hs) with head h occupying columns [h*hs:(h+1)*hs].
    def fuse_w(w):   # (H, C, hs) -> (C, H*hs)
        return jnp.transpose(w, (1, 0, 2)).reshape(C, Hhs)

    def fuse_b(b):   # (H, 1, hs) -> (1, H*hs)
        return b.reshape(1, Hhs)

    wqkv = jnp.concatenate([fuse_w(wq), fuse_w(wk), fuse_w(wv)], axis=-1).astype(jnp.bfloat16)
    bqkv = jnp.concatenate([fuse_b(bq), fuse_b(bk), fuse_b(bv)], axis=-1).astype(jnp.float32)

    # Output projection, lane-padded to Cp; bf16 weights, f32 bias.
    wpp = jnp.pad(wp, ((0, 0), (0, Cp - C))).astype(jnp.bfloat16)            # (H*hs, Cp)
    bpp = jnp.pad(bp, ((0, 0), (0, Cp - C))).astype(jnp.float32)             # (1, Cp)

    kernel = functools.partial(_mha_kernel, num_heads=H, head_size=hs)

    out = pl.pallas_call(
        kernel,
        out_shape=jax.ShapeDtypeStruct((B, T, Cp), x.dtype),
        grid_spec=pltpu.PrefetchScalarGridSpec(
            num_scalar_prefetch=0,
            grid=(B,),
            in_specs=[
                pl.BlockSpec((None, T, C), lambda b: (b, 0, 0)),     # x, batch dim squeezed
                pl.BlockSpec((C, 3 * Hhs), lambda b: (0, 0)),        # wqkv (resident across grid)
                pl.BlockSpec((1, 3 * Hhs), lambda b: (0, 0)),        # bqkv
                pl.BlockSpec((Hhs, Cp), lambda b: (0, 0)),           # wp
                pl.BlockSpec((1, Cp), lambda b: (0, 0)),             # bp
            ],
            out_specs=pl.BlockSpec((None, T, Cp), lambda b: (b, 0, 0)),
        ),
        compiler_params=pltpu.CompilerParams(
            dimension_semantics=("parallel",)),                      # batch -> megacore on v7x
    )(x, wqkv, bqkv, wpp, bpp)

    return out[:, :, :C]


def _reference(x, wq, bq, wk, bk, wv, bv, wp, bp, *, head_size):
    """Pure-JAX (f32) reference mirroring the PyTorch forward (eval mode, kv_cache=None)."""
    B, T, C = x.shape
    H = wq.shape[0]
    outs = []
    tril = jnp.tril(jnp.ones((T, T), dtype=bool))
    for h in range(H):
        q = x @ wq[h] + bq[h]
        k = x @ wk[h] + bk[h]
        v = x @ wv[h] + bv[h]
        s = (q @ jnp.swapaxes(k, -1, -2)) / math.sqrt(head_size)
        s = jnp.where(tril, s, -jnp.inf)
        p = jax.nn.softmax(s, axis=-1)
        outs.append(p @ v)
    concat = jnp.concatenate(outs, axis=-1)
    return concat @ wp + bp


if __name__ == "__main__":
    # Config consistent with the module: embeddings_size=32, num_heads=4,
    # head_size = embeddings_size // num_heads = 8, context_size = seq = 8, batch = 2.
    B, T, C = 2, 8, 32
    num_heads = 4
    head_size = C // num_heads

    key = jax.random.PRNGKey(0)
    ks = jax.random.split(key, 10)

    def init(k, shape, fan_in):
        bound = 1.0 / math.sqrt(fan_in)
        return jax.random.uniform(k, shape, jnp.float32, -bound, bound)

    x = jax.random.normal(ks[0], (B, T, C), jnp.float32)

    # Per-head projection weights, stacked: (H, C, hs); biases: (H, 1, hs)
    wq = init(ks[1], (num_heads, C, head_size), C)
    bq = init(ks[2], (num_heads, 1, head_size), C)
    wk = init(ks[3], (num_heads, C, head_size), C)
    bk = init(ks[4], (num_heads, 1, head_size), C)
    wv = init(ks[5], (num_heads, C, head_size), C)
    bv = init(ks[6], (num_heads, 1, head_size), C)
    # Output projection: (H*hs, C), bias (1, C)
    wp = init(ks[7], (num_heads * head_size, C), num_heads * head_size)
    bp = init(ks[8], (1, C), num_heads * head_size)

    out = multi_head_attention(x, wq, bq, wk, bk, wv, bv, wp, bp,
                               num_heads=num_heads, head_size=head_size)
    out = jax.block_until_ready(out)

    ref = _reference(x, wq, bq, wk, bk, wv, bv, wp, bp, head_size=head_size)
    assert out.shape == (B, T, C)
    # Tolerance accounts for bf16 MXU operands (f32 accumulation) and approx reciprocal.
    assert jnp.allclose(out, ref, atol=2e-2, rtol=2e-2), "mismatch vs reference"

    print("KERNEL_OK")
</pallas_src>

<mosaic_0001>
module attributes {stable_mosaic.version = 11 : i64} {
  func.func @_mha_kernel(%arg0: i32, %arg1: memref<1x8x32xf32, #tpu.memory_space<vmem>>, %arg2: memref<32x96xbf16, #tpu.memory_space<vmem>>, %arg3: memref<1x96xf32, #tpu.memory_space<vmem>>, %arg4: memref<32x128xbf16, #tpu.memory_space<vmem>>, %arg5: memref<1x128xf32, #tpu.memory_space<vmem>>, %arg6: memref<1x8x128xf32, #tpu.memory_space<vmem>>) attributes {dimension_semantics = [#tpu.dimension_semantics<parallel>], iteration_bounds = array<i64: 2>, scalar_prefetch = 0 : i64, scratch_operands = 0 : i64, tpu.core_type = #tpu.core_type<tc>, window_params = [{transform_indices = @transform_0, window_bounds = array<i64: 1, 8, 32>}, {pipeline_mode = #tpu.pipeline_mode<synchronous>, transform_indices = @transform_1, window_bounds = array<i64: 32, 96>}, {pipeline_mode = #tpu.pipeline_mode<synchronous>, transform_indices = @transform_2, window_bounds = array<i64: 1, 96>}, {pipeline_mode = #tpu.pipeline_mode<synchronous>, transform_indices = @transform_3, window_bounds = array<i64: 32, 128>}, {pipeline_mode = #tpu.pipeline_mode<synchronous>, transform_indices = @transform_4, window_bounds = array<i64: 1, 128>}, {transform_indices = @transform_5, window_bounds = array<i64: 1, 8, 128>}]} {
    %c0 = arith.constant 0 : index
    %c0_0 = arith.constant 0 : index
    %c0_1 = arith.constant 0 : index
    %0 = vector.load %arg1[%c0, %c0_0, %c0_1] : memref<1x8x32xf32, #tpu.memory_space<vmem>>, vector<1x8x32xf32>
    %1 = vector.shape_cast %0 : vector<1x8x32xf32> to vector<8x32xf32>
    %2 = arith.truncf %1 : vector<8x32xf32> to vector<8x32xbf16>
    %c0_2 = arith.constant 0 : index
    %c0_3 = arith.constant 0 : index
    %3 = vector.load %arg2[%c0_2, %c0_3] : memref<32x96xbf16, #tpu.memory_space<vmem>>, vector<32x96xbf16>
    %cst = arith.constant dense<0.000000e+00> : vector<8x96xf32>
    %4 = tpu.matmul %2, %3, %cst {dimension_numbers = #tpu.dot_dimension_numbers<[1], [0], [0], [1], [0, 0, 1, 1], [], []>} : vector<8x32xbf16>, vector<32x96xbf16>, vector<8x96xf32> -> vector<8x96xf32>
    %c0_4 = arith.constant 0 : index
    %c0_5 = arith.constant 0 : index
    %5 = vector.load %arg3[%c0_4, %c0_5] : memref<1x96xf32, #tpu.memory_space<vmem>>, vector<1x96xf32>
    %6 = vector.broadcast %5 : vector<1x96xf32> to vector<8x96xf32>
    %7 = arith.addf %4, %6 : vector<8x96xf32>
    %8 = vector.extract_strided_slice %7 {offsets = [0, 0], sizes = [8, 32], strides = [1, 1]} : vector<8x96xf32> to vector<8x32xf32>
    %9 = vector.shape_cast %8 : vector<8x32xf32> to vector<8x4x8xf32>
    %10 = tpu.transpose %9, [1, 0, 2] : vector<8x4x8xf32> -> vector<4x8x8xf32>
    %cst_6 = arith.constant 0.353553385 : f32
    %11 = vector.broadcast %cst_6 : f32 to vector<4x8x8xf32>
    %12 = arith.mulf %10, %11 : vector<4x8x8xf32>
    %13 = vector.extract_strided_slice %7 {offsets = [0, 32], sizes = [8, 32], strides = [1, 1]} : vector<8x96xf32> to vector<8x32xf32>
    %14 = vector.shape_cast %13 : vector<8x32xf32> to vector<8x4x8xf32>
    %15 = tpu.transpose %14, [1, 0, 2] : vector<8x4x8xf32> -> vector<4x8x8xf32>
    %16 = vector.extract_strided_slice %7 {offsets = [0, 64], sizes = [8, 32], strides = [1, 1]} : vector<8x96xf32> to vector<8x32xf32>
    %17 = vector.shape_cast %16 : vector<8x32xf32> to vector<8x4x8xf32>
    %18 = tpu.transpose %17, [1, 0, 2] : vector<8x4x8xf32> -> vector<4x8x8xf32>
    %19 = arith.truncf %12 : vector<4x8x8xf32> to vector<4x8x8xbf16>
    %20 = arith.truncf %15 : vector<4x8x8xf32> to vector<4x8x8xbf16>
    "tpu.trace_start"() <{level = 10 : i32, message = "hqd,hkd->hqk"}> : () -> ()
    %cst_7 = arith.constant dense<0.000000e+00> : vector<4x8x8xf32>
    %21 = tpu.matmul %19, %20, %cst_7 {dimension_numbers = #tpu.dot_dimension_numbers<[2], [2], [1], [1], [0, 0, 0, 1, 1, 1], [0], [0]>} : vector<4x8x8xbf16>, vector<4x8x8xbf16>, vector<4x8x8xf32> -> vector<4x8x8xf32>
    "tpu.trace_stop"() : () -> ()
    %22 = tpu.iota {dimensions = array<i32: 0>} : vector<8x8xi32>
    %23 = tpu.iota {dimensions = array<i32: 1>} : vector<8x8xi32>
    %24 = arith.cmpi sle, %23, %22 : vector<8x8xi32>
    %25 = vector.shape_cast %24 : vector<8x8xi1> to vector<1x8x8xi1>
    %cst_8 = arith.constant -1.000000e+30 : f32
    %26 = vector.shape_cast %25 : vector<1x8x8xi1> to vector<1x8x8xi1>
    %27 = vector.broadcast %26 : vector<1x8x8xi1> to vector<4x8x8xi1>
    %28 = vector.broadcast %cst_8 : f32 to vector<4x8x8xf32>
    %29 = arith.select %27, %21, %28 : vector<4x8x8xi1>, vector<4x8x8xf32>
    %cst_9 = arith.constant dense<0xFF800000> : vector<4x8xf32>
    %30 = vector.multi_reduction <maximumf>, %29, %cst_9 [2] : vector<4x8x8xf32> to vector<4x8xf32>
    %31 = vector.shape_cast %30 : vector<4x8xf32> to vector<4x8x1xf32>
    %32 = vector.broadcast %31 : vector<4x8x1xf32> to vector<4x8x8xf32>
    %33 = arith.subf %29, %32 : vector<4x8x8xf32>
    %34 = math.exp %33 : vector<4x8x8xf32>
    %cst_10 = arith.constant dense<0.000000e+00> : vector<4x8xf32>
    %35 = vector.multi_reduction <add>, %34, %cst_10 [2] : vector<4x8x8xf32> to vector<4x8xf32>
    %36 = vector.shape_cast %35 : vector<4x8xf32> to vector<4x8x1xf32>
    %37 = arith.truncf %34 : vector<4x8x8xf32> to vector<4x8x8xbf16>
    %38 = arith.truncf %18 : vector<4x8x8xf32> to vector<4x8x8xbf16>
    "tpu.trace_start"() <{level = 10 : i32, message = "hqk,hkd->hqd"}> : () -> ()
    %cst_11 = arith.constant dense<0.000000e+00> : vector<4x8x8xf32>
    %39 = tpu.matmul %37, %38, %cst_11 {dimension_numbers = #tpu.dot_dimension_numbers<[2], [1], [1], [2], [0, 0, 0, 1, 1, 2], [0], [0]>} : vector<4x8x8xbf16>, vector<4x8x8xbf16>, vector<4x8x8xf32> -> vector<4x8x8xf32>
    "tpu.trace_stop"() : () -> ()
    %40 = tpu.reciprocal %36 {approx = true} : vector<4x8x1xf32> -> vector<4x8x1xf32>
    %41 = vector.broadcast %40 : vector<4x8x1xf32> to vector<4x8x8xf32>
    %42 = arith.mulf %39, %41 : vector<4x8x8xf32>
    %43 = tpu.transpose %42, [1, 0, 2] : vector<4x8x8xf32> -> vector<8x4x8xf32>
    %44 = vector.shape_cast %43 : vector<8x4x8xf32> to vector<8x32xf32>
    %45 = arith.truncf %44 : vector<8x32xf32> to vector<8x32xbf16>
    %c0_12 = arith.constant 0 : index
    %c0_13 = arith.constant 0 : index
    %46 = vector.load %arg4[%c0_12, %c0_13] : memref<32x128xbf16, #tpu.memory_space<vmem>>, vector<32x128xbf16>
    %cst_14 = arith.constant dense<0.000000e+00> : vector<8x128xf32>
    %47 = tpu.matmul %45, %46, %cst_14 {dimension_numbers = #tpu.dot_dimension_numbers<[1], [0], [0], [1], [0, 0, 1, 1], [], []>} : vector<8x32xbf16>, vector<32x128xbf16>, vector<8x128xf32> -> vector<8x128xf32>
    %c0_15 = arith.constant 0 : index
    %c0_16 = arith.constant 0 : index
    %48 = vector.load %arg5[%c0_15, %c0_16] : memref<1x128xf32, #tpu.memory_space<vmem>>, vector<1x128xf32>
    %49 = vector.broadcast %48 : vector<1x128xf32> to vector<8x128xf32>
    %50 = arith.addf %47, %49 : vector<8x128xf32>
    %c0_17 = arith.constant 0 : index
    %c0_18 = arith.constant 0 : index
    %c0_19 = arith.constant 0 : index
    %51 = vector.load %arg6[%c0_17, %c0_18, %c0_19] : memref<1x8x128xf32, #tpu.memory_space<vmem>>, vector<1x8x128xf32>
    %52 = vector.shape_cast %51 : vector<1x8x128xf32> to vector<8x128xf32>
    %53 = vector.shape_cast %50 : vector<8x128xf32> to vector<1x8x128xf32>
    tpu.vector_store %arg6[%c0_17, %c0_18, %c0_19], %53 {strides = array<i32>} : memref<1x8x128xf32, #tpu.memory_space<vmem>>, vector<1x8x128xf32>,
    return
  }
  func.func @transform_0(%arg0: i32) -> (i32, i32, i32) {
    %c0_i32 = arith.constant 0 : i32
    %c0_i32_0 = arith.constant 0 : i32
    %c0_i32_1 = arith.constant 0 : i32
    return %arg0, %c0_i32, %c0_i32_0 : i32, i32, i32
  }
  func.func @transform_1(%arg0: i32) -> (i32, i32) {
    %c0_i32 = arith.constant 0 : i32
    %c0_i32_0 = arith.constant 0 : i32
    %c0_i32_1 = arith.constant 0 : i32
    return %c0_i32, %c0_i32_0 : i32, i32
  }
  func.func @transform_2(%arg0: i32) -> (i32, i32) {
    %c0_i32 = arith.constant 0 : i32
    %c0_i32_0 = arith.constant 0 : i32
    %c0_i32_1 = arith.constant 0 : i32
    return %c0_i32, %c0_i32_0 : i32, i32
  }
  func.func @transform_3(%arg0: i32) -> (i32, i32) {
    %c0_i32 = arith.constant 0 : i32
    %c0_i32_0 = arith.constant 0 : i32
    %c0_i32_1 = arith.constant 0 : i32
    return %c0_i32, %c0_i32_0 : i32, i32
  }
  func.func @transform_4(%arg0: i32) -> (i32, i32) {
    %c0_i32 = arith.constant 0 : i32
    %c0_i32_0 = arith.constant 0 : i32
    %c0_i32_1 = arith.constant 0 : i32
    return %c0_i32, %c0_i32_0 : i32, i32
  }
  func.func @transform_5(%arg0: i32) -> (i32, i32, i32) {
    %c0_i32 = arith.constant 0 : i32
    %c0_i32_0 = arith.constant 0 : i32
    %c0_i32_1 = arith.constant 0 : i32
    return %arg0, %c0_i32, %c0_i32_0 : i32, i32, i32
  }
}

</mosaic_0001>

<bundles_post_ra>
// kernel: tpu_custom_call.1
= control target key start
LH: loop header
LB: loop body
LE: loop exit
PB: predicated region body
PF: predicated region fallthrough
CT: control target
= control target key end

     0   :  { %10 = vsyncpa [#allocation3], 0  ;;  %s2388_s0 = inlined_call_operand.hbm [shape: f32[2,8,32], index: 0, kind: input, shape index: {}]   ;;  %s2389_s1 = inlined_call_operand.hbm [shape: bf16[32,96], index: 1, kind: input, shape index: {}]   ;;  %s2390_s2 = inlined_call_operand.vmem [shape: f32[1,96], index: 2, kind: input, shape index: {}]   ;;  %s2391_s3 = inlined_call_operand.hbm [shape: bf16[32,128], index: 3, kind: input, shape index: {}]   ;;  %s2392_s4 = inlined_call_operand.vmem [shape: f32[1,128], index: 4, kind: input, shape index: {}]   ;;  %s2393_s5 = inlined_call_operand.hbm [shape: f32[2,8,128], index: 5, kind: output, shape index: {}]  }
   0x1   :  { %12 = vsyncpa [#allocation3 + $0x1], 0 }
   0x2   :  { %13 = vsyncpa [#allocation6], 0 }
   0x3   :  { %14 = vsyncpa [#allocation4], 0 }
   0x4   :  { %16 = vsyncpa [#allocation4 + $0x1], 0  ;;  %s1983_s18 = smov 0   ;;  %s1985_s19 = smov 0  }
   0x5   :  { %s1987_s20 = smov 0   ;;  %s1989_s21 = smov 0  }
   0x6 LB: > { %s2004_s22 = sadd.s32 4294967295, %s1933_s21   ;;  %s1550_s23 = sadd.s32 4294967294, %s1933_s21   ;;  %s1933_s21 = sphi %s1989_s21, %s2413_s21   ;;  %s1929_s20 = sphi %s1987_s20, %s2412_s20   ;;  %s1925_s19 = sphi %s1985_s19, %s2411_s19   ;;  %s1921_s18 = sphi %s1983_s18, %s2410_s18  }
   0x7   : > { %p42_p0 = scmp.ne.s32.totalorder %s1925_s19, %s1921_s18  ;;  %p2394_p1 = scmp.eq.s32.totalorder %s2004_s22, 0 }
   0x8   : > { %p156_p3 = scmp.eq.s32.totalorder %s1550_s23, 1  ;;  %p1551_p5 = scmp.ge.s32.totalorder %s1933_s21, 1 }
   0x9   : > { %p2013_p4 = por %p2394_p1, %p42_p0  ;;  %p163_p7 = scmp.lt.s32.totalorder %s1933_s21, 3 }
   0xa   : > { %p2018_p6 = por %p156_p3, %p42_p0  ;;  %s1935_s27 = smov [#allocation5]  }
   0xb   : > { %s2397_s24 = scalar_select %p2013_p4, 1, 0 }
   0xc   : > { %s2398_s25 = scalar_select %p2018_p6, 1, 0 }
   0xd   : > { %p2023_p8 = pnand %p1551_p5, %p163_p7  ;;  %s175_s28 = sshll.u32 %s1935_s27, 4  ;;  %s2027_s28 = int_to_ptr.vmem [resolvable:$true] %s175_s28 }
   0xe   : > { %s1936_s30 = smov [#allocation7]   ;;  %s1777_s9 = scalar_lea.hbm %s2389_s1, 256 }
   0xf   : > { %p1688_p9 = pneg %p2023_p8  ;;  %s191_s6 = sshll.u32 %s1936_s30, 4  ;;  %s2038_s6 = int_to_ptr.vmem [resolvable:$true] %s191_s6 }
  0x10   : > { %p1778_p12 = scmp.ne.s32.totalorder %s2389_s1, %s1777_s9  ;;  %p1784_p5 = scmp.lt.u32.totalorder %s1777_s9, %s2389_s1 }
  0x11   : > { %p2034_p11 = pnand %p1688_p9, %p2394_p1 }
  0x13   : > { %p1779_p13 = pneg %p2034_p11 }
  0x15   : > { %p1780_p0 = pnand %p1779_p13, %p1778_p12 }
  0x17   : > { %p1781_p3 = pneg %p1780_p0 }
  0x19   : > { %p1786_p7 = pnand %p1784_p5, %p1781_p3 }
  0x1b   : > { %1789 = shalt.err (!%p1786_p7)
}
  0x1c   : > { %s1790_s14 = scalar_lea.vmem %s2027_s28, 256  ;;  %p1798_p2 = scmp.lt.s32.totalorder %s2027_s28, %s2027_s28 }
  0x1d   : > { %p1791_p9 = scmp.ne.s32.totalorder %s2027_s28, %s1790_s14  ;;  %p1799_p12 = scmp.lt.s32.totalorder %s1790_s14, %s1790_s14 }
  0x1f   : > { %p1793_p10 = pnand %p1791_p9, %p1779_p13  ;;  %p1800_p0 = por %p1799_p12, %p1798_p2 }
  0x21   : > { %p1794_p1 = pneg %p1793_p10 }
  0x23   : > { %p1801_p6 = pnand %p1800_p0, %p1794_p1 }
  0x25   : > { %1804 = shalt.err (!%p1801_p6)
}
  0x26   : > { %s1937_s15 = smov 64   ;;  %s1938_s16 = smov 4  }
  0x27   : > { %1691 = dma.hbm_to_vmem [thread:$0]  (!%p2034_p11), %s2389_s1, 256, %s2027_s28, [#allocation6], %s1937_s15, %s1937_s15, %s1938_s16  }
  0x28   : > { %s1805_s7 = scalar_lea.hbm %s2391_s3, 256 }
  0x29   : > { %p1806_p2 = scmp.ne.s32.totalorder %s2391_s3, %s1805_s7  ;;  %p1812_p10 = scmp.lt.u32.totalorder %s1805_s7, %s2391_s3 }
  0x2b   : > { %p1808_p1 = pnand %p1806_p2, %p1779_p13 }
  0x2d   : > { %p1809_p6 = pneg %p1808_p1 }
  0x2f   : > { %p1814_p3 = pnand %p1812_p10, %p1809_p6 }
  0x31   : > { %1817 = shalt.err (!%p1814_p3)
}
  0x32   : > { %s1818_s28 = scalar_lea.vmem %s2038_s6, 256  ;;  %p1826_p12 = scmp.lt.s32.totalorder %s2038_s6, %s2038_s6 }
  0x33   : > { %p1819_p5 = scmp.ne.s32.totalorder %s2038_s6, %s1818_s28  ;;  %p1827_p0 = scmp.lt.s32.totalorder %s1818_s28, %s1818_s28 }
  0x35   : > { %p1821_p7 = pnand %p1819_p5, %p1779_p13  ;;  %p1828_p2 = por %p1827_p0, %p1826_p12 }
  0x37   : > { %p1822_p9 = pneg %p1821_p7 }
  0x39   : > { %p1829_p1 = pnand %p1828_p2, %p1822_p9 }
  0x3b   : > { %1832 = shalt.err (!%p1829_p1)
}
  0x3c   : > { %1694 = dma.hbm_to_vmem [thread:$0]  (!%p2034_p11), %s2391_s3, 256, %s2038_s6, [#allocation6], %s1937_s15, %s1937_s15, %s1938_s16  }
  0x3d   : > { %s2093_s14 = sadd.s32 1, %s1933_s21   ;;  %s29_s29 = sadd.s32 1, %s1929_s20 }
  0x3e   : > { %s26_s17 = ssub.s32 %s1933_s21, %s2093_s14  ;;  %p36_p13 = scmp.ne.s32.totalorder %s1929_s20, %s1925_s19 }
  0x3f   : > { %p27_p6 = scmp.eq.s32.totalorder %s26_s17, 0  ;;  %p37_p10 = scmp.eq.s32.totalorder %s1933_s21, 0 }
  0x40   : > { %p2401_p3 = scmp.eq.s32.totalorder %s2004_s22, 1  ;;  %p1705_p7 = scmp.lt.s32.totalorder %s1933_s21, 2 }
  0x41   : > { %s2109_s27 = scalar_select %p27_p6, %s1929_s20, %s29_s29  }
  0x42   : > { %p2103_p5 = por %p2401_p3, %p36_p13  ;;  %p38_p9 = por %p37_p10, %p36_p13 }
  0x43   : > { %s208_s30 = sand.u32 1, %s1929_s20   ;;  %s1556_s6 = sshll.u32 %s1933_s21, 7 }
  0x44   : > { %s2402_s23 = scalar_select %p2103_p5, 1, 0 }
  0x45   : > { %s1555_s7 = sshll.u32 %s208_s30, 3  ;;  %s2116_s8 = scalar_lea.hbm %s2388_s0, %s1556_s6 }
  0x46   : > { %s212_s9 = scalar_lea.vmem [#allocation2], %s1555_s7  ;;  %p2120_p11 = pnand %p1705_p7, %p38_p9 }
  0x47   : > { %s219_s10 = sshll.u32 %s212_s9, 4  ;;  %s209_s28 = scalar_lea.sflag [#allocation3], %s208_s30  ;;  %s2118_s10 = int_to_ptr.vmem [resolvable:$true] %s219_s10 }
  0x48   : > { %s1833_s12 = scalar_lea.hbm %s2116_s8, 128  ;;  %p1835_p0 = pneg %p2120_p11 }
  0x49   : > { %p1834_p12 = scmp.ne.s32.totalorder %s2116_s8, %s1833_s12  ;;  %s1838_s17 = scalar_lea.hbm %s2388_s0, 256 }
  0x4a   : > { %p1839_p13 = scmp.lt.u32.totalorder %s2116_s8, %s2388_s0  ;;  %p1840_p6 = scmp.lt.u32.totalorder %s1838_s17, %s1833_s12 }
  0x4b   : > { %p1836_p2 = pnand %p1835_p0, %p1834_p12  ;;  %p1842_p3 = scmp.lt.u32.totalorder %s1833_s12, %s2116_s8 }
  0x4c   : > { %p1841_p10 = por %p1840_p6, %p1839_p13 }
  0x4d   : > { %p1837_p1 = pneg %p1836_p2 }
  0x4e   : > { %p1843_p7 = por %p1842_p3, %p1841_p10 }
  0x50   : > { %p1844_p9 = pnand %p1843_p7, %p1837_p1 }
  0x52   : > { %1847 = shalt.err (!%p1844_p9)
}
  0x53   : > { %s1848_s30 = scalar_lea.vmem %s2118_s10, 128  ;;  %s1939_s15 = smov [#allocation2]  }
  0x54   : > { %p1849_p12 = scmp.ne.s32.totalorder %s2118_s10, %s1848_s30  ;;  %s1853_s16 = sshll.u32 %s1939_s15, 4  ;;  %s1854_s16 = int_to_ptr.vmem [resolvable:$false] %s1853_s16 }
  0x55   : > { %s1855_s9 = scalar_lea.vmem %s1854_s16, 256  ;;  %p1856_p4 = scmp.lt.s32.totalorder %s2118_s10, %s1854_s16 }
  0x56   : > { %p1851_p2 = pnand %p1849_p12, %p1835_p0  ;;  %p1857_p13 = scmp.lt.s32.totalorder %s1855_s9, %s1848_s30 }
  0x58   : > { %p1852_p5 = pneg %p1851_p2  ;;  %p1858_p6 = por %p1857_p13, %p1856_p4 }
  0x5a   : > { %p1859_p10 = pnand %p1858_p6, %p1852_p5 }
  0x5c   : > { %1862 = shalt.err (!%p1859_p10)
}
  0x5d   : > { %1698 = dma.hbm_to_vmem [thread:$0]  (!%p2120_p11), %s2116_s8, 128, %s2118_s10, %s209_s28  }
  0x5e   : > { %228 = sbr.rel (%p2023_p8) target bundleno = 1600 (0x640), region = 40  ;;  %s2152_s12 = sand.u32 (!%p2023_p8), 1, %s1925_s19  }
  0x5f   : > { %s1558_s13 = sshll.u32 (!%p2023_p8), %s2152_s12, 3  ;;  %s231_s29 = scalar_lea.sflag (!%p2023_p8), [#allocation3], %s2152_s12 }
  0x60   : > { %s234_s17 = scalar_lea.vmem (!%p2023_p8), [#allocation2], %s1558_s13  ;;  %p2404_p4 = scmp.ne.s32.totalorder (!%p2023_p8), %s2397_s24, 0 }
  0x65   : > { %1908 = dma.done.wait (%p2404_p4), %s231_s29, 128  }
  0x66   : > { %1910 = vsyncadd (%p2404_p4), %s231_s29, 4294967168  ;;  %p2405_p5 = scmp.eq.s32.totalorder %s2004_s22, 0 }
  0x68   : > { %1912 = dma.done.wait (%p2405_p5), [#allocation6], 512   ;;  %p2406_p8 = pmov %p2405_p5 }
  0x69   : > { %v1940_v0 = vmov 0.0   ;;  %vm1941_vm0 = vmmov 0   ;;  %v1757_v1 = vld [vmem:[#allocation5] sm:$0xff]   ;;  %v1758_v2 = vld [vmem:[#allocation5 + $0x8] sm:$0xff]   ;;  %v270_v3 = vld [vmem:[%s234_s17] sm:$0xff]  ;;  %vm295_vm1 = vcmask 261120   ;;  %v354_v16 = vlaneseq }
  0x6a   : > { %1914 = vsyncadd (%p2406_p8), [#allocation6], 4294966784  ;;  %1612 = vmatprep.subr.bf16.mxu0 %v1940_v0  ;;  %1616 = vmatprep.mubr.msk.bf16.mxu0 %vm1941_vm0, %v1940_v0  ;;  %v271_v4 = vpack.c.bf16 %v270_v3, %v270_v3  ;;  %v1562_v5 = vld [vmem:[%s2390_s2] ss:$0 sm:$0xff]  ;;  %s1942_s8 = smov 104   ;;  %s1943_s10 = smov 120  }
  0x6b   : > { %1620 = vmatprep.subr.bf16.mxu1 %v1940_v0  ;;  %1622 = vmatprep.mubr.msk.bf16.mxu1 %vm1941_vm0, %v1940_v0  ;;  %s1944_s11 = smov 96   ;;  %s1945_s28 = smov 112   ;;  %v1947_v14 = vmov 1983009808   ;;  %v2189_v18 = vshrl.u32 %v354_v16, 7  ;;  %vm793_vm2 = vcmask 64512  }
  0x6c   : > { %1613 = vmatpush3.bf16.msra.mxu0 %v1757_v1  ;;  %s1946_s7 = smov 64   ;;  %v352_v15 = vunpack.c.l.s4 %v1947_v14  ;;  %v1948_v19 = vmov 1934713408   ;;  %vm1036_vm4 = vcmask 1043456   ;;  %s1949_s6 = smov 16   ;;  %vm1375_vm5 = vcmask 130048  }
  0x6d   : > { %1614 = vmatprep.subr.bf16.mxu0 %v1940_v0  ;;  %v384_v20 = vunpack.c.l.s4 %v1948_v19  ;;  %s1950_s30 = smov 8   ;;  %s1951_s15 = smov 24   ;;  %vm1377_vm6 = vcmask 195584  }
  0x6e   : > { %v353_v17 = vunpack.c.0.s8 %v352_v15  ;;  %s1587_s29 = sshll.u32 %s2004_s22, 7  ;;  %s268_s17 = scalar_lea.vmem [#allocation8], %s1558_s13 }
  0x6f   : > { %v385_v26 = vunpack.c.0.s8 %v384_v20  ;;  %s1461_s24 = sshll.u32 %s268_s17, 4  ;;  %s1448_s22 = scalar_lea.sflag [#allocation4], %s2152_s12  ;;  %s2346_s24 = int_to_ptr.vmem [resolvable:$true] %s1461_s24 }
  0x70   : > { %1615 = vmatpush3.bf16.msra.mxu0 %v1758_v2  ;;  %v2194_v23 = vsub.s32 %v353_v17, %v2189_v18  ;;  %p2407_p0 = scmp.ne.s32.totalorder %s2402_s23, 0  ;;  %s1952_s13 = smov [#allocation8]  }
  0x71   : > { %1626 = vmatprep.subr.bf16.mxu0 %v1940_v0  ;;  %v2203_v31 = vsub.s32 %v385_v26, %v2189_v18 }
  0x73   : > { %1617 = vmatmul.mubr.msk.bf16.vlgmr.msra.gmra.mrb[0].mxu0 %vm295_vm1, %v271_v4 }
  0x74   : > { %1628 = vmatprep.mubr.msk.bf16.mxu0 %vm1941_vm0, %v1940_v0 }
 0x146   : > { %v333_v6 = vpop.f32.mrb[0].mxu0 }
 0x147   : > { %v334_v7 = vadd.f32 %v1562_v5, %v333_v6  ;;  %v1618_v8 = vpop.f32.mrb[1].mxu0 }
 0x148   : > { %v336_v9 = vpop.f32.mrb[2].mxu0 }
 0x149   : > { %346 = vrot.lane.b32.xlu1 %v334_v7, %s1942_s8  ;;  %340 = vrot.lane.b32.xlu0 %v334_v7, %s1943_s10  ;;  %v1619_v10 = vpop.f32.mrb[3].mxu0  ;;  %s2344_s10 = scalar_lea.hbm %s2393_s5, %s1587_s29 }
 0x14d   : > { %489 = vrot.lane.b32.xlu1 %v334_v7, %s1944_s11  ;;  %343 = vrot.lane.b32.xlu0 %v334_v7, %s1945_s28  ;;  %s1867_s28 = sshll.u32 %s1952_s13, 4  ;;  %s1868_s28 = int_to_ptr.vmem [resolvable:$false] %s1867_s28 }
 0x14e   : > { %p1870_p7 = scmp.lt.s32.totalorder %s2346_s24, %s1868_s28 }
 0x1bb   : > { %v341_v11 = vpop.permute.xlu0 %340  ;;  %v2180_v12 = vpop.permute.xlu1 %346 }
 0x1bc   : > { %491 = vrot.lane.b32.xlu0 %v341_v11, %s1944_s11  ;;  %v365_v24 = vcombine.low %v341_v11, %v2180_v12  ;;  %v366_v25 = vcombine.high %v341_v11, %v2180_v12 }
 0x1be   : > { %v373_v29 = vrot.slane %v365_v24, %v2194_v23  ;;  %v380_v30 = vrot.slane %v366_v25, %v2194_v23 }
 0x1bf   : > { %v2182_v13 = vpop.permute.xlu0 %343  ;;  %v490_v36 = vpop.permute.xlu1 %489 }
 0x1c0   : > { %495 = vrot.lane.b32.xlu0 %v2180_v12, %s1944_s11  ;;  %493 = vrot.lane.b32.xlu1 %v2182_v13, %s1944_s11  ;;  %v349_v21 = vcombine.low %v334_v7, %v2182_v13  ;;  %v350_v22 = vcombine.high %v334_v7, %v2182_v13  ;;  %s1863_s11 = scalar_lea.vmem %s2346_s24, 128 }
 0x1c1   : > { %p1864_p11 = scmp.ne.s32.totalorder %s2346_s24, %s1863_s11 }
 0x1c2   : > { %v357_v27 = vrot.slane %v349_v21, %v2194_v23  ;;  %v364_v28 = vrot.slane %v350_v22, %v2194_v23 }
 0x1c3   : > { %p1865_p1 = pnand %p1864_p11, %p2407_p0 }
 0x1c4   : > { %637 = vrot.lane.b32.xlu0 %v334_v7, %s1946_s7  ;;  %639 = vrot.lane.b32.xlu1 %v341_v11, %s1946_s7  ;;  %v381_v32 = vcombine.low %v357_v27, %v373_v29  ;;  %v382_v33 = vcombine.high %v357_v27, %v373_v29  ;;  %v397_v34 = vcombine.low %v364_v28, %v380_v30 }
 0x1c5   : > { %v398_v35 = vcombine.high %v364_v28, %v380_v30  ;;  %p1866_p3 = pneg %p1865_p1 }
 0x1c6   : > { %v389_v38 = vrot.slane %v381_v32, %v2203_v31  ;;  %v396_v39 = vrot.slane %v382_v33, %v2203_v31  ;;  %v405_v40 = vrot.slane %v397_v34, %v2203_v31 }
 0x1c7   : > { %v412_v41 = vrot.slane %v398_v35, %v2203_v31 }
 0x1c8   : > { %v417_v48 = vcombine.low %v389_v38, %v396_v39  ;;  %v1566_v49 = vcombine.high %v389_v38, %v396_v39 }
 0x1c9   : > { %v433_v50 = vcombine.low %v405_v40, %v412_v41  ;;  %v1567_v51 = vcombine.high %v405_v40, %v412_v41 }
 0x1ca   : > { %v424_v60 = vrot.slane %v417_v48, %v2194_v23  ;;  %v432_v61 = vrot.slane %v1566_v49, %v2194_v23 }
 0x1cb   : > { %v440_v62 = vrot.slane %v433_v50, %v2194_v23  ;;  %v448_v63 = vrot.slane %v1567_v51, %v2194_v23 }
 0x1cc   : > { %v449_v9 = vcombine.low %v424_v60, %v432_v61  ;;  %v450_v33 = vcombine.high %v424_v60, %v432_v61 }
 0x1cd   : > { %v465_v10 = vcombine.low %v440_v62, %v448_v63  ;;  %v466_v34 = vcombine.high %v440_v62, %v448_v63 }
 0x1ce   : > { %v457_v26 = vrot.slane %v449_v9, %v2203_v31 }
 0x1cf   : > { %v473_v27 = vrot.slane %v465_v10, %v2203_v31 }
 0x1d1   : > { %v482_v38 = vcombine.high %v457_v26, %v473_v27 }
 0x22e   : > { %v492_v37 = vpop.permute.xlu0 %491 }
 0x232   : > { %v494_v42 = vpop.permute.xlu1 %493  ;;  %v496_v43 = vpop.permute.xlu0 %495 }
 0x233   : > { %v501_v44 = vcombine.low %v490_v36, %v494_v42  ;;  %v502_v45 = vcombine.high %v490_v36, %v494_v42  ;;  %v517_v46 = vcombine.low %v492_v37, %v496_v43  ;;  %v518_v47 = vcombine.high %v492_v37, %v496_v43 }
 0x234   : > { %v481_v37 = vcombine.low %v457_v26, %v473_v27 }
 0x235   : > { %v509_v52 = vrot.slane %v501_v44, %v2194_v23  ;;  %v516_v53 = vrot.slane %v502_v45, %v2194_v23  ;;  %v525_v54 = vrot.slane %v517_v46, %v2194_v23  ;;  %v532_v55 = vrot.slane %v518_v47, %v2194_v23 }
 0x236   : > { %v485_v43 = vmul.f32 0.35355338, %v481_v37  ;;  %v486_v44 = vmul.f32 0.35355338, %v482_v38  ;;  %v464_v45 = vrot.slane %v450_v33, %v2203_v31  ;;  %v480_v46 = vrot.slane %v466_v34, %v2203_v31 }
 0x237   : > { %v533_v56 = vcombine.low %v509_v52, %v525_v54  ;;  %v534_v57 = vcombine.high %v509_v52, %v525_v54  ;;  %v549_v58 = vcombine.low %v516_v53, %v532_v55  ;;  %v550_v59 = vcombine.high %v516_v53, %v532_v55 }
 0x238   : > { %v785_v49 = vpack.c.bf16 %v485_v43, %v485_v43  ;;  %v786_v50 = vpack.c.bf16 %v486_v44, %v486_v44  ;;  %v483_v51 = vcombine.low %v464_v45, %v480_v46  ;;  %v484_v52 = vcombine.high %v464_v45, %v480_v46 }
 0x239   : > { %v541_v1 = vrot.slane %v533_v56, %v2203_v31  ;;  %v548_v2 = vrot.slane %v534_v57, %v2203_v31  ;;  %v557_v3 = vrot.slane %v549_v58, %v2203_v31  ;;  %v564_v4 = vrot.slane %v550_v59, %v2203_v31 }
 0x23a   : > { %v487_v55 = vmul.f32 0.35355338, %v483_v51  ;;  %v488_v56 = vmul.f32 0.35355338, %v484_v52  ;;  %v981_v59 = vand.u32 127, %v354_v16 }
 0x23b   : > { %v569_v5 = vcombine.low %v541_v1, %v548_v2  ;;  %v1568_v6 = vcombine.high %v541_v1, %v548_v2  ;;  %v585_v7 = vcombine.low %v557_v3, %v564_v4  ;;  %v1569_v8 = vcombine.high %v557_v3, %v564_v4 }
 0x23c   : > { %v787_v57 = vpack.c.bf16 %v487_v55, %v487_v55  ;;  %v788_v58 = vpack.c.bf16 %v488_v56, %v488_v56  ;;  %vm982_vm3 = vcmp.le.s32.totalorder %v981_v59, %v2189_v18 }
 0x23d   : > { %v576_v11 = vrot.slane %v569_v5, %v2194_v23  ;;  %v584_v14 = vrot.slane %v1568_v6, %v2194_v23  ;;  %v592_v15 = vrot.slane %v585_v7, %v2194_v23  ;;  %v600_v17 = vrot.slane %v1569_v8, %v2194_v23 }
 0x23f   : > { %v601_v19 = vcombine.low %v576_v11, %v584_v14  ;;  %v617_v20 = vcombine.low %v592_v15, %v600_v17  ;;  %v602_v21 = vcombine.high %v576_v11, %v584_v14  ;;  %v618_v22 = vcombine.high %v592_v15, %v600_v17 }
 0x241   : > { %v609_v24 = vrot.slane %v601_v19, %v2203_v31  ;;  %v625_v25 = vrot.slane %v617_v20, %v2203_v31  ;;  %v616_v30 = vrot.slane %v602_v21, %v2203_v31  ;;  %v632_v32 = vrot.slane %v618_v22, %v2203_v31 }
 0x243   : > { %v633_v28 = vcombine.low %v609_v24, %v625_v25  ;;  %v634_v29 = vcombine.high %v609_v24, %v625_v25  ;;  %v635_v41 = vcombine.low %v616_v30, %v632_v32  ;;  %v636_v42 = vcombine.high %v616_v30, %v632_v32  ;;  %v638_v25 = vpop.permute.xlu0 %637 }
 0x245   : > { %v789_v35 = vpack.c.bf16 %v633_v28, %v633_v28  ;;  %v790_v36 = vpack.c.bf16 %v634_v29, %v634_v29  ;;  %v791_v47 = vpack.c.bf16 %v635_v41, %v635_v41  ;;  %v792_v48 = vpack.c.bf16 %v636_v42, %v636_v42 }
 0x247   : > { %v798_v39 = vsel %vm793_vm2, %v789_v35, 0  ;;  %v844_v40 = vsel %vm793_vm2, %v790_v36, 0  ;;  %v890_v53 = vsel %vm793_vm2, %v791_v47, 0  ;;  %v936_v54 = vsel %vm793_vm2, %v792_v48, 0 }
 0x248   : > { %1621 = vmatpush3.bf16.xpose.msra.mxu1 %v798_v39  ;;  %1627 = vmatpush3.bf16.xpose.msra.mxu0 %v844_v40 }
 0x249   : > { %1632 = vmatprep.subr.bf16.mxu1 %v1940_v0  ;;  %1638 = vmatprep.subr.bf16.mxu0 %v1940_v0 }
 0x24f   : > { %1623 = vmatmul.mubr.msk.bf16.vlgmr.msra.gmra.mrb[0].mxu1 %vm793_vm2, %v785_v49  ;;  %1629 = vmatmul.mubr.msk.bf16.vlgmr.msra.gmra.mrb[4].mxu0 %vm793_vm2, %v786_v50 }
 0x250   : > { %1633 = vmatpush3.bf16.xpose.msra.mxu1 %v890_v53  ;;  %1639 = vmatpush3.bf16.xpose.msra.mxu0 %v936_v54 }
 0x251   : > { %1634 = vmatprep.mubr.msk.bf16.mxu1 %vm1941_vm0, %v1940_v0  ;;  %1640 = vmatprep.mubr.msk.bf16.mxu0 %vm1941_vm0, %v1940_v0 }
 0x252   : > { %1644 = vmatprep.subr.bf16.mxu1 %v1940_v0  ;;  %1650 = vmatprep.subr.bf16.mxu0 %v1940_v0 }
 0x257   : > { %1635 = vmatmul.mubr.msk.bf16.vlgmr.msra.gmra.mrb[4].mxu1 %vm793_vm2, %v787_v57  ;;  %1641 = vmatmul.mubr.msk.bf16.vlgmr.msra.gmra.mrb[8].mxu0 %vm793_vm2, %v788_v58 }
 0x258   : > { %1646 = vmatprep.mubr.msk.bf16.mxu1 %vm1941_vm0, %v1940_v0  ;;  %1652 = vmatprep.mubr.msk.bf16.mxu0 %vm1941_vm0, %v1940_v0 }
 0x322   : > { %v834_v60 = vpop.f32.mrb[0].mxu1  ;;  %v880_v61 = vpop.f32.mrb[4].mxu0 }
 0x323   : > { %v985_v62 = vsel %vm982_vm3, %v834_v60, -1e+30  ;;  %v986_v63 = vsel %vm982_vm3, %v880_v61, -1e+30  ;;  %v1624_v1 = vpop.f32.mrb[1].mxu1  ;;  %v1630_v2 = vpop.f32.mrb[5].mxu0 }
 0x324   : > { %v837_v3 = vpop.f32.mrb[2].mxu1  ;;  %v883_v4 = vpop.f32.mrb[6].mxu0  ;;  %v989_v5 = vsel %vm793_vm2, %v985_v62, -inf  ;;  %v992_v6 = vsel %vm793_vm2, %v986_v63, -inf }
 0x325   : > { %990 = vmax.xlane.f32.xlu1 %v989_v5  ;;  %v1625_v16 = vpop.f32.mrb[3].mxu1  ;;  %993 = vmax.xlane.f32.xlu0 %v992_v6  ;;  %v1631_v7 = vpop.f32.mrb[7].mxu0 }
 0x32a   : > { %v926_v8 = vpop.f32.mrb[4].mxu1  ;;  %v972_v9 = vpop.f32.mrb[8].mxu0 }
 0x32b   : > { %v1636_v10 = vpop.f32.mrb[5].mxu1  ;;  %v1642_v11 = vpop.f32.mrb[9].mxu0  ;;  %v2267_v20 = vsel %vm982_vm3, %v926_v8, -1e+30  ;;  %v2271_v21 = vsel %vm982_vm3, %v972_v9, -1e+30 }
 0x32c   : > { %v929_v14 = vpop.f32.mrb[6].mxu1  ;;  %v975_v15 = vpop.f32.mrb[10].mxu0  ;;  %v995_v22 = vsel %vm793_vm2, %v2267_v20, -inf  ;;  %v998_v24 = vsel %vm793_vm2, %v2271_v21, -inf }
 0x32d   : > { %v1637_v17 = vpop.f32.mrb[7].mxu1  ;;  %v1643_v19 = vpop.f32.mrb[11].mxu0 }
 0x336   : > { %641 = vrot.lane.b32.xlu1 %v2182_v13, %s1946_s7  ;;  %v640_v13 = vpop.permute.xlu1 %639 }
 0x33b   : > { %643 = vrot.lane.b32.xlu0 %v2180_v12, %s1946_s7  ;;  %s1869_s7 = scalar_lea.vmem %s1868_s28, 256 }
 0x33c   : > { %p1871_p9 = scmp.lt.s32.totalorder %s1869_s7, %s1863_s11 }
 0x33e   : > { %p1872_p12 = por %p1871_p9, %p1870_p7 }
 0x340   : > { %p1873_p2 = pnand %p1872_p12, %p1866_p3 }
 0x35a   : > { %996 = vmax.xlane.f32.xlu1 %v995_v22  ;;  %999 = vmax.xlane.f32.xlu0 %v998_v24 }
 0x3b2   : > { %v991_v26 = vpop.xlane.xlu1 %990  ;;  %v994_v12 = vpop.xlane.xlu0 %993 }
 0x3b3   : > { %v1001_v27 = vsub.f32 %v985_v62, %v991_v26  ;;  %v1002_v28 = vsub.f32 %v986_v63, %v994_v12 }
 0x3b5   : > { %v1005_v29 = vmul.f32 1.442695, %v1001_v27  ;;  %v1007_v30 = vmul.f32 1.442695, %v1002_v28 }
 0x3b6   : > { %v642_v32 = vpop.permute.xlu1 %641  ;;  %v644_v18 = vpop.permute.xlu0 %643 }
 0x3b7   : > { %1761 = vpow2.f32 %v1005_v29  ;;  %v649_v33 = vcombine.low %v638_v25, %v642_v32  ;;  %v650_v34 = vcombine.high %v638_v25, %v642_v32  ;;  %v665_v35 = vcombine.low %v640_v13, %v644_v18 }
 0x3b8   : > { %1763 = vpow2.f32 %v1007_v30  ;;  %v666_v36 = vcombine.high %v640_v13, %v644_v18 }
 0x3b9   : > { %v657_v37 = vrot.slane %v649_v33, %v2194_v23  ;;  %v664_v38 = vrot.slane %v650_v34, %v2194_v23  ;;  %v673_v39 = vrot.slane %v665_v35, %v2194_v23 }
 0x3ba   : > { %v680_v40 = vrot.slane %v666_v36, %v2194_v23 }
 0x3bb   : > { %v681_v41 = vcombine.low %v657_v37, %v673_v39  ;;  %v682_v42 = vcombine.high %v657_v37, %v673_v39 }
 0x3bc   : > { %v697_v43 = vcombine.low %v664_v38, %v680_v40  ;;  %v698_v44 = vcombine.high %v664_v38, %v680_v40 }
 0x3bd   : > { %v689_v45 = vrot.slane %v681_v41, %v2203_v31  ;;  %v696_v46 = vrot.slane %v682_v42, %v2203_v31 }
 0x3be   : > { %v705_v47 = vrot.slane %v697_v43, %v2203_v31  ;;  %v712_v48 = vrot.slane %v698_v44, %v2203_v31 }
 0x3bf   : > { %v717_v49 = vcombine.low %v689_v45, %v696_v46  ;;  %v1570_v50 = vcombine.high %v689_v45, %v696_v46 }
 0x3c0   : > { %v733_v51 = vcombine.low %v705_v47, %v712_v48  ;;  %v1571_v52 = vcombine.high %v705_v47, %v712_v48 }
 0x3c1   : > { %v1762_v53 = vpop.eup %1761  ;;  %v724_v54 = vrot.slane %v717_v49, %v2194_v23  ;;  %v732_v55 = vrot.slane %v1570_v50, %v2194_v23 }
 0x3c2   : > { %v1764_v56 = vpop.eup %1763  ;;  %v740_v57 = vrot.slane %v733_v51, %v2194_v23  ;;  %v748_v58 = vrot.slane %v1571_v52, %v2194_v23  ;;  %v1013_v59 = vsel %vm793_vm2, %v1762_v53, 0.0  ;;  %v1025_v19 = vpack.c.bf16 %v1762_v53, %v1762_v53 }
 0x3c3   : > { %v1016_v60 = vsel %vm793_vm2, %v1764_v56, 0.0  ;;  %1014 = vadd.xlane.f32.xlu0 %v1013_v59  ;;  %v749_v61 = vcombine.low %v724_v54, %v732_v55  ;;  %v750_v62 = vcombine.high %v724_v54, %v732_v55  ;;  %v1026_v22 = vpack.c.bf16 %v1764_v56, %v1764_v56 }
 0x3c4   : > { %1017 = vadd.xlane.f32.xlu1 %v1016_v60  ;;  %v765_v63 = vcombine.low %v740_v57, %v748_v58  ;;  %v766_v1 = vcombine.high %v740_v57, %v748_v58 }
 0x3c5   : > { %v757_v2 = vrot.slane %v749_v61, %v2203_v31  ;;  %v764_v3 = vrot.slane %v750_v62, %v2203_v31 }
 0x3c6   : > { %v773_v4 = vrot.slane %v765_v63, %v2203_v31  ;;  %v780_v5 = vrot.slane %v766_v1, %v2203_v31 }
 0x3c8   : > { %v781_v6 = vcombine.low %v757_v2, %v773_v4  ;;  %v782_v16 = vcombine.high %v757_v2, %v773_v4  ;;  %v783_v7 = vcombine.low %v764_v3, %v780_v5  ;;  %v784_v8 = vcombine.high %v764_v3, %v780_v5 }
 0x3ca   : > { %v1029_v9 = vpack.c.bf16 %v781_v6, %v781_v6  ;;  %v1030_v10 = vpack.c.bf16 %v782_v16, %v782_v16  ;;  %v1031_v15 = vpack.c.bf16 %v783_v7, %v783_v7  ;;  %v1032_v17 = vpack.c.bf16 %v784_v8, %v784_v8  ;;  %v1759_v16 = vld [vmem:[#allocation7] sm:$0xff]  }
 0x3cc   : > { %v1038_v11 = vsel %vm1036_vm4, %v1029_v9, 0  ;;  %v1084_v14 = vsel %vm1036_vm4, %v1030_v10, 0  ;;  %v1130_v24 = vsel %vm1036_vm4, %v1031_v15, 0  ;;  %v1176_v13 = vsel %vm1036_vm4, %v1032_v17, 0 }
 0x3cd   : > { %1645 = vmatpush3.bf16.msra.mxu1 %v1038_v11  ;;  %1651 = vmatpush3.bf16.msra.mxu0 %v1084_v14 }
 0x3ce   : > { %1656 = vmatprep.subr.bf16.mxu1 %v1940_v0  ;;  %1662 = vmatprep.subr.bf16.mxu0 %v1940_v0 }
 0x3d0   : > { %1647 = vmatmul.mubr.msk.bf16.vlgmr.msra.gmra.mrb[8].mxu1 %vm793_vm2, %v1025_v19  ;;  %1653 = vmatmul.mubr.msk.bf16.vlgmr.msra.gmra.mrb[12].mxu0 %vm793_vm2, %v1026_v22  ;;  %v1760_v19 = vld [vmem:[#allocation7 + $0x8] sm:$0xff]  }
 0x3d1   : > { %1657 = vmatpush3.bf16.msra.mxu1 %v1130_v24  ;;  %1663 = vmatpush3.bf16.msra.mxu0 %v1176_v13 }
 0x3d2   : > { %1658 = vmatprep.mubr.msk.bf16.mxu1 %vm1941_vm0, %v1940_v0  ;;  %1664 = vmatprep.mubr.msk.bf16.mxu0 %vm1941_vm0, %v1940_v0 }
 0x3d3   : > { %1668 = vmatprep.subr.bf16.mxu1 %v1940_v0 }
 0x3e7   : > { %v997_v25 = vpop.xlane.xlu1 %996  ;;  %v1000_v26 = vpop.xlane.xlu0 %999 }
 0x3e8   : > { %v1003_v12 = vsub.f32 %v2267_v20, %v997_v25  ;;  %v1004_v27 = vsub.f32 %v2271_v21, %v1000_v26 }
 0x3ea   : > { %v1009_v28 = vmul.f32 1.442695, %v1003_v12  ;;  %v1011_v29 = vmul.f32 1.442695, %v1004_v27 }
 0x3ec   : > { %1765 = vpow2.f32 %v1009_v28 }
 0x3ed   : > { %1767 = vpow2.f32 %v1011_v29 }
 0x3f6   : > { %v1766_v30 = vpop.eup %1765 }
 0x3f7   : > { %v1768_v32 = vpop.eup %1767  ;;  %v1019_v18 = vsel %vm793_vm2, %v1766_v30, 0.0  ;;  %v1027_v33 = vpack.c.bf16 %v1766_v30, %v1766_v30 }
 0x3f8   : > { %1020 = vadd.xlane.f32.xlu0 %v1019_v18  ;;  %v1022_v34 = vsel %vm793_vm2, %v1768_v32, 0.0  ;;  %v1028_v35 = vpack.c.bf16 %v1768_v32, %v1768_v32 }
 0x3f9   : > { %1023 = vadd.xlane.f32.xlu1 %v1022_v34  ;;  %1659 = vmatmul.mubr.msk.bf16.vlgmr.msra.gmra.mrb[12].mxu1 %vm793_vm2, %v1027_v33 }
 0x3fa   : > { %1665 = vmatmul.mubr.msk.bf16.vlgmr.msra.gmra.mrb[16].mxu0 %vm793_vm2, %v1028_v35  ;;  %1672 = vmatprep.mubr.msk.bf16.mxu1 %vm1941_vm0, %v1940_v0 }
 0x3fb   : > { %1669 = vmatpush3.bf16.msra.mxu1 %v1759_v16 }
 0x3fc   : > { %1670 = vmatprep.subr.bf16.mxu1 %v1940_v0 }
 0x3ff   : > { %1671 = vmatpush3.bf16.msra.mxu1 %v1760_v19 }
 0x450   : > { %v1015_v42 = vpop.xlane.xlu0 %1014 }
 0x451   : > { %v1018_v43 = vpop.xlane.xlu1 %1017  ;;  %1769 = vrcp.f32 %v1015_v42 }
 0x452   : > { %1771 = vrcp.f32 %v1018_v43  ;;  %v1582_v43 = vld [vmem:[%s2392_s4] ss:$0 sm:$0xff] }
 0x45b   : > { %v1770_v46 = vpop.eup %1769 }
 0x45c   : > { %v1772_v47 = vpop.eup %1771 }
 0x485   : > { %v1021_v44 = vpop.xlane.xlu0 %1020 }
 0x486   : > { %v1024_v45 = vpop.xlane.xlu1 %1023  ;;  %1773 = vrcp.f32 %v1021_v44 }
 0x487   : > { %1775 = vrcp.f32 %v1024_v45 }
 0x490   : > { %v1774_v48 = vpop.eup %1773 }
 0x491   : > { %v1776_v50 = vpop.eup %1775 }
 0x4a3   : > { %v1074_v20 = vpop.f32.mrb[8].mxu1  ;;  %v1120_v21 = vpop.f32.mrb[12].mxu0 }
 0x4a4   : > { %v1648_v36 = vpop.f32.mrb[9].mxu1  ;;  %v1654_v37 = vpop.f32.mrb[13].mxu0  ;;  %v1222_v51 = vmul.f32 %v1770_v46, %v1074_v20  ;;  %v1223_v55 = vmul.f32 %v1772_v47, %v1120_v21 }
 0x4a5   : > { %v1077_v38 = vpop.f32.mrb[10].mxu1  ;;  %v1123_v39 = vpop.f32.mrb[14].mxu0 }
 0x4a6   : > { %v1649_v40 = vpop.f32.mrb[11].mxu1  ;;  %v1655_v41 = vpop.f32.mrb[15].mxu0 }
 0x4cc   : > { %v1166_v49 = vpop.f32.mrb[12].mxu1 }
 0x4cd   : > { %v1224_v52 = vmul.f32 %v1774_v48, %v1166_v49  ;;  %v1212_v53 = vpop.f32.mrb[16].mxu0  ;;  %v1660_v54 = vpop.f32.mrb[13].mxu1 }
 0x4ce   : > { %v1225_v56 = vmul.f32 %v1776_v50, %v1212_v53  ;;  %v1666_v57 = vpop.f32.mrb[17].mxu0  ;;  %v1169_v58 = vpop.f32.mrb[14].mxu1 }
 0x4cf   : > { %v1226_v59 = vcombine.low %v1222_v51, %v1224_v52  ;;  %v1227_v60 = vcombine.high %v1222_v51, %v1224_v52  ;;  %v1215_v61 = vpop.f32.mrb[18].mxu0  ;;  %v1661_v62 = vpop.f32.mrb[15].mxu1 }
 0x4d0   : > { %v1242_v63 = vcombine.low %v1223_v55, %v1225_v56  ;;  %v1243_v1 = vcombine.high %v1223_v55, %v1225_v56  ;;  %v1667_v2 = vpop.f32.mrb[19].mxu0 }
 0x4d1   : > { %v1234_v3 = vrot.slane %v1226_v59, %v2194_v23  ;;  %v1241_v4 = vrot.slane %v1227_v60, %v2194_v23 }
 0x4d2   : > { %v1250_v5 = vrot.slane %v1242_v63, %v2194_v23  ;;  %v1257_v6 = vrot.slane %v1243_v1, %v2194_v23 }
 0x4d4   : > { %v1258_v7 = vcombine.low %v1234_v3, %v1250_v5  ;;  %v1259_v8 = vcombine.high %v1234_v3, %v1250_v5  ;;  %v1274_v9 = vcombine.low %v1241_v4, %v1257_v6  ;;  %v1275_v10 = vcombine.high %v1241_v4, %v1257_v6 }
 0x4d6   : > { %v1266_v11 = vrot.slane %v1258_v7, %v2203_v31  ;;  %v1273_v14 = vrot.slane %v1259_v8, %v2203_v31  ;;  %v1282_v15 = vrot.slane %v1274_v9, %v2203_v31  ;;  %v1289_v17 = vrot.slane %v1275_v10, %v2203_v31 }
 0x4d8   : > { %v1294_v22 = vcombine.low %v1266_v11, %v1273_v14  ;;  %v1580_v24 = vcombine.high %v1266_v11, %v1273_v14  ;;  %v1310_v13 = vcombine.low %v1282_v15, %v1289_v17  ;;  %v1581_v25 = vcombine.high %v1282_v15, %v1289_v17 }
 0x4da   : > { %v1301_v26 = vrot.slane %v1294_v22, %v2194_v23  ;;  %v1309_v12 = vrot.slane %v1580_v24, %v2194_v23  ;;  %v1317_v27 = vrot.slane %v1310_v13, %v2194_v23  ;;  %v1325_v28 = vrot.slane %v1581_v25, %v2194_v23 }
 0x4dc   : > { %v1327_v29 = vcombine.high %v1301_v26, %v1309_v12  ;;  %v1343_v30 = vcombine.high %v1317_v27, %v1325_v28  ;;  %v1326_v32 = vcombine.low %v1301_v26, %v1309_v12  ;;  %v1342_v18 = vcombine.low %v1317_v27, %v1325_v28 }
 0x4de   : > { %v1341_v0 = vrot.slane %v1327_v29, %v2203_v31  ;;  %v1357_v33 = vrot.slane %v1343_v30, %v2203_v31  ;;  %v1334_v34 = vrot.slane %v1326_v32, %v2203_v31  ;;  %v1350_v35 = vrot.slane %v1342_v18, %v2203_v31 }
 0x4e0   : > { %v1360_v20 = vcombine.low %v1341_v0, %v1357_v33  ;;  %v1359_v21 = vcombine.high %v1334_v34, %v1350_v35  ;;  %v1361_v36 = vcombine.high %v1341_v0, %v1357_v33  ;;  %v1358_v37 = vcombine.low %v1334_v34, %v1350_v35 }
 0x4e2   : > { %1367 = vrot.lane.b32.xlu1 %v1360_v20, %s1949_s6  ;;  %1363 = vrot.lane.b32.xlu0 %v1359_v21, %s1950_s30 }
 0x4e6   : > { %1371 = vrot.lane.b32.xlu1 %v1361_v36, %s1951_s15 }
 0x554   : > { %v1368_v23 = vpop.permute.xlu1 %1367  ;;  %v1364_v38 = vpop.permute.xlu0 %1363 }
 0x555   : > { %v1374_v39 = vsel %vm793_vm2, %v1358_v37, %v1364_v38 }
 0x556   : > { %v1376_v31 = vsel %vm1375_vm5, %v1374_v39, %v1368_v23 }
 0x558   : > { %v1372_v40 = vpop.permute.xlu1 %1371 }
 0x559   : > { %v1378_v41 = vsel %vm1377_vm6, %v1376_v31, %v1372_v40 }
 0x55a   : > { %v1379_v42 = vpack.c.bf16 %v1378_v41, %v1378_v41 }
 0x55c   : > { %1673 = vmatmul.mubr.msk.bf16.vlgmr.msra.gmra.mrb[16].mxu1 %vm295_vm1, %v1379_v42 }
 0x62f   : > { %v1440_v44 = vpop.f32.mrb[16].mxu1 }
 0x630   : > { %v1441_v45 = vadd.f32 %v1582_v43, %v1440_v44  ;;  %v1674_v46 = vpop.f32.mrb[17].mxu1 }
 0x631   : > { %v1443_v47 = vpop.f32.mrb[18].mxu1 }
 0x632   : > { %1446 = vst [vmem:[%s268_s17] sm:$0xff] %v1441_v45  ;;  %v1675_v48 = vpop.f32.mrb[19].mxu1 }
 0x633   : > { %1876 = shalt.err (!%p1873_p2)
}
 0x634   : > { %s1877_s12 = scalar_lea.hbm %s2344_s10, 128  ;;  %s1881_s15 = scalar_lea.hbm %s2393_s5, 256 }
 0x635   : > { %p1878_p13 = scmp.ne.s32.totalorder %s2344_s10, %s1877_s12  ;;  %p1882_p4 = scmp.lt.u32.totalorder %s2344_s10, %s2393_s5 }
 0x636   : > { %p1883_p5 = scmp.lt.u32.totalorder %s1881_s15, %s1877_s12  ;;  %p1885_p11 = scmp.lt.u32.totalorder %s1877_s12, %s2344_s10 }
 0x637   : > { %p1879_p6 = pnand %p1878_p13, %p2407_p0 }
 0x638   : > { %p1884_p8 = por %p1883_p5, %p1882_p4 }
 0x639   : > { %p1880_p10 = pneg %p1879_p6 }
 0x63a   : > { %p1886_p1 = por %p1885_p11, %p1884_p8 }
 0x63c   : > { %p1887_p3 = pnand %p1886_p1, %p1880_p10 }
 0x63e   : > { %1890 = shalt.err (!%p1887_p3)
}
 0x63f   : > { %1686 = dma.vmem_to_hbm [thread:$0]  (%p2407_p0), %s2346_s24, 128, %s2344_s10, %s1448_s22  }
 0x640 PF: > { %s1473_s29 = sand.u32 1, %s1921_s18   ;;  %p2408_p7 = scmp.ne.s32.totalorder %s2398_s25, 0 }
 0x641   : > { %p2409_p9 = scmp.ge.s32.totalorder %s1933_s21, 2  ;;  %s1474_s17 = scalar_lea.sflag [#allocation4], %s1473_s29 }
 0x643   : > { %p1700_p12 = pnand %p2409_p9, %p2408_p7 }
 0x645   : > { %1916 = dma.done.wait (!%p1700_p12), %s1474_s17, 128  }
 0x646   : > { %1918 = vsyncadd (!%p1700_p12), %s1474_s17, 4294967168  ;;  %p19_p2 = scmp.ge.s32.totalorder %s2093_s14, 4   ;;  %s2410_s18 = smov %s1925_s19 }
 0x647   : > { %s2411_s19 = smov %s1929_s20  ;;  %s2412_s20 = smov %s2109_s27 }
 0x648   : > { %s2413_s21 = smov %s2093_s14  ;;  %21 = sbr.rel (!%p19_p2) target bundleno = 6 (0x6), region = 93 }
 0x64f   :  { %1479 = vsyncpa [#allocation3], 1 }
 0x650   :  { %1481 = vsyncpa [#allocation3 + $0x1], 1 }
 0x651   :  { %1482 = vsyncpa [#allocation6], 1 }
 0x652   :  { %1483 = vsyncpa [#allocation4], 1 }
 0x653   :  { %1485 = vsyncpa [#allocation4 + $0x1], 1 }

</bundles_post_ra>
